<compile_context>
chip_gen: v7x
topology: tpu7x:2x2x1
jax: 0.10.0
libtpu: 0.0.40
codegen_flags: <defaults>
</compile_context>

<pallas_src>
import functools

import jax
import jax.numpy as jnp
from jax import lax
from jax.experimental import pallas as pl
from jax.experimental.pallas import tpu as pltpu

LANE = 128  # lane-dense padded class / hidden dimension


def net_kernel(x_ref, w1_ref, b1_ref, w2_ref, b2_ref, a_ref, out_ref, *, K, alpha, num_class):
    x = x_ref[...]                                        # [N, F]  f32

    # ---- MLP (eval mode: dropout = identity) ----
    # Hidden dim zero-padded to 128 lanes; ReLU(0 + 0) = 0 so padded hidden lanes are inert.
    h = jnp.dot(x, w1_ref[...], preferred_element_type=jnp.float32) + b1_ref[...]
    h = jnp.maximum(h, 0.0)                               # ReLU, [N, HPAD]
    # w2 / b2 are zero-padded to LANE columns -> padded logit lanes are exactly 0.
    h = jnp.dot(h, w2_ref[...], preferred_element_type=jnp.float32) + b2_ref[...]   # [N, LANE]

    # ---- APPNP propagation: z <- A_scaled @ z + alpha * z0, K iterations ----
    # a_ref already holds (1-alpha) * A_hat in bf16; the matmul runs on the bf16 MXU path,
    # accumulation + combine stay f32.
    a_scaled = a_ref[...]                                 # bf16 [N, N], never upcast
    z0 = h
    az0 = alpha * z0                                      # hoisted out of the loop (f32)

    def body(_, z):
        az = jnp.dot(a_scaled, z.astype(jnp.bfloat16),
                     preferred_element_type=jnp.float32)
        return az + az0

    z = lax.fori_loop(0, K, body, h, unroll=True)         # K is static -> fully unrolled

    # ---- log_softmax over dim=1 (real classes only; padded lanes masked out) ----
    lane_id = lax.broadcasted_iota(jnp.int32, z.shape, 1)
    valid = lane_id < num_class
    zm = jnp.where(valid, z, -jnp.inf)
    m = jnp.max(zm, axis=1, keepdims=True)
    s = zm - m
    lse = jnp.log(jnp.sum(jnp.where(valid, jnp.exp(s), 0.0), axis=1, keepdims=True))
    out_ref[...] = jnp.where(valid, s - lse, 0.0)         # lane-dense [N, LANE] store


def appnp_net_forward(x, w1t, b1, w2t, b2, a_hat, *, K, alpha):
    N, F_in = x.shape
    H = w1t.shape[1]
    C = w2t.shape[1]
    HP = max(LANE, ((H + LANE - 1) // LANE) * LANE)       # hidden dim padded to 128 lanes

    # Zero-pad hidden and class dims so every intermediate is lane-dense.
    w1t_p = jnp.zeros((F_in, HP), jnp.float32).at[:, :H].set(w1t)
    b1_p = jnp.zeros((1, HP), jnp.float32).at[:, :H].set(b1)
    w2t_p = jnp.zeros((HP, LANE), jnp.float32).at[:H, :C].set(w2t)
    b2_p = jnp.zeros((1, LANE), jnp.float32).at[:, :C].set(b2)
    # (1 - alpha) folded into A_hat; the only O(N^2) operand ships and computes as bf16.
    a_scaled = ((1.0 - alpha) * a_hat).astype(jnp.bfloat16)

    vmem = pl.BlockSpec(memory_space=pltpu.MemorySpace.VMEM)

    cost = pl.CostEstimate(
        flops=int(2 * N * F_in * HP + 2 * N * HP * LANE
                  + 2 * K * N * N * LANE + 2 * K * N * LANE),
        transcendentals=int(N * LANE + N),
        bytes_accessed=int(4 * (N * F_in + F_in * HP + HP + HP * LANE + LANE + N * LANE)
                           + 2 * N * N),
    )

    out_pad = pl.pallas_call(
        functools.partial(net_kernel, K=K, alpha=alpha, num_class=C),
        out_shape=jax.ShapeDtypeStruct((N, LANE), jnp.float32),
        in_specs=[vmem] * 6,
        out_specs=vmem,
        compiler_params=pltpu.CompilerParams(vmem_limit_bytes=32 * 1024 * 1024),
        cost_estimate=cost,
    )(x, w1t_p, b1_p, w2t_p, b2_p, a_scaled)
    return out_pad[:, :C]


def gcn_norm_dense(edge_index, num_nodes):
    """Dense D^{-1/2}(A+I)D^{-1/2} — plain-JAX glue (scatter from edge_index).

    Matches PyG gcn_norm semantics: duplicate edges accumulate weight, existing self
    loops are replaced by a single weight-1 self loop per node.
    """
    # TODO(synk): at real graph sizes replace this dense O(N^2) path with a CSR-style
    # scalar-prefetched gather kernel (PrefetchScalarGridSpec) so cost scales with E.
    src, dst = edge_index
    adj = jnp.zeros((num_nodes, num_nodes), jnp.float32)
    adj = adj.at[dst, src].add(1.0)                       # message flows src -> dst; dups sum
    eye = jnp.eye(num_nodes, dtype=jnp.float32)
    adj = adj * (1.0 - eye) + eye                         # add_remaining_self_loops(fill=1)
    deg = jnp.sum(adj, axis=1)
    d_inv_sqrt = jnp.where(deg > 0, lax.rsqrt(deg), 0.0)
    return adj * d_inv_sqrt[:, None] * d_inv_sqrt[None, :]


if __name__ == "__main__":
    # Small deterministic config: num_feat=16, hidden=32, num_class=8, num_layers=2,
    # dropout inactive (eval), with_bn=False, struct=0, K=10, alpha=0.1, appnp_drop=0.
    N, F_IN, H, C = 64, 16, 32, 8
    K, ALPHA = 10, 0.1

    key = jax.random.PRNGKey(0)
    kx, ke, kw1, kb1, kw2, kb2 = jax.random.split(key, 6)

    # Node features
    x = jax.random.normal(kx, (N, F_IN), jnp.float32)

    # Random graph: 256 directed edges
    E = 256
    src = jax.random.randint(ke, (E,), 0, N)
    dst = jax.random.randint(jax.random.fold_in(ke, 1), (E,), 0, N)
    edge_index = jnp.stack([src, dst])
    a_hat = gcn_norm_dense(edge_index, N)

    # PyTorch-style Linear init, stored pre-transposed as [in, out] for x @ W layout.
    lim1 = 1.0 / jnp.sqrt(jnp.float32(F_IN))
    w1t = jax.random.uniform(kw1, (F_IN, H), jnp.float32, -lim1, lim1)
    b1 = jax.random.uniform(kb1, (1, H), jnp.float32, -lim1, lim1)
    lim2 = 1.0 / jnp.sqrt(jnp.float32(H))
    w2t = jax.random.uniform(kw2, (H, C), jnp.float32, -lim2, lim2)
    b2 = jax.random.uniform(kb2, (1, C), jnp.float32, -lim2, lim2)

    out = appnp_net_forward(x, w1t, b1, w2t, b2, a_hat, K=K, alpha=ALPHA)
    out = jax.block_until_ready(out)

    # Pure-JAX reference mirroring the kernel's numerics: f32 MLP, then K iterations of
    # bf16-operand / f32-accumulate propagation with (1-alpha) pre-folded into A.
    with jax.default_matmul_precision("float32"):
        h_ref = jnp.maximum(x @ w1t + b1, 0.0) @ w2t + b2
    a_ref_bf = ((1.0 - ALPHA) * a_hat).astype(jnp.bfloat16)
    az0_ref = ALPHA * h_ref
    z_ref = h_ref
    for _ in range(K):
        z_ref = jnp.dot(a_ref_bf, z_ref.astype(jnp.bfloat16),
                        preferred_element_type=jnp.float32) + az0_ref
    ref = jax.nn.log_softmax(z_ref, axis=1)

    assert out.shape == (N, C), f"bad output shape {out.shape}"
    # Tolerance covers bf16 per-iteration rounding / MXU accumulation-order differences.
    assert jnp.allclose(out, ref, atol=2e-3, rtol=2e-3), "mismatch vs reference"

    print("KERNEL_OK")
</pallas_src>

<mosaic_0001>
module attributes {stable_mosaic.version = 11 : i64} {
  func.func @net_kernel(%arg0: memref<64x16xf32, #tpu.memory_space<vmem>>, %arg1: memref<16x128xf32, #tpu.memory_space<vmem>>, %arg2: memref<1x128xf32, #tpu.memory_space<vmem>>, %arg3: memref<128x128xf32, #tpu.memory_space<vmem>>, %arg4: memref<1x128xf32, #tpu.memory_space<vmem>>, %arg5: memref<64x64xbf16, #tpu.memory_space<vmem>>, %arg6: memref<64x128xf32, #tpu.memory_space<vmem>>) attributes {dimension_semantics = [], scalar_prefetch = 0 : i64, scratch_operands = 0 : i64, tpu.core_type = #tpu.core_type<tc>} {
    %c0 = arith.constant 0 : index
    %c0_0 = arith.constant 0 : index
    %0 = vector.load %arg0[%c0, %c0_0] : memref<64x16xf32, #tpu.memory_space<vmem>>, vector<64x16xf32>
    %c0_1 = arith.constant 0 : index
    %c0_2 = arith.constant 0 : index
    %1 = vector.load %arg1[%c0_1, %c0_2] : memref<16x128xf32, #tpu.memory_space<vmem>>, vector<16x128xf32>
    %cst = arith.constant dense<0.000000e+00> : vector<64x128xf32>
    %2 = tpu.matmul %0, %1, %cst {dimension_numbers = #tpu.dot_dimension_numbers<[1], [0], [0], [1], [0, 0, 1, 1], [], []>} : vector<64x16xf32>, vector<16x128xf32>, vector<64x128xf32> -> vector<64x128xf32>
    %c0_3 = arith.constant 0 : index
    %c0_4 = arith.constant 0 : index
    %3 = vector.load %arg2[%c0_3, %c0_4] : memref<1x128xf32, #tpu.memory_space<vmem>>, vector<1x128xf32>
    %4 = vector.broadcast %3 : vector<1x128xf32> to vector<64x128xf32>
    %5 = arith.addf %2, %4 : vector<64x128xf32>
    %cst_5 = arith.constant 0.000000e+00 : f32
    %6 = vector.broadcast %cst_5 : f32 to vector<64x128xf32>
    %7 = arith.maximumf %5, %6 : vector<64x128xf32>
    %c0_6 = arith.constant 0 : index
    %c0_7 = arith.constant 0 : index
    %8 = vector.load %arg3[%c0_6, %c0_7] : memref<128x128xf32, #tpu.memory_space<vmem>>, vector<128x128xf32>
    %cst_8 = arith.constant dense<0.000000e+00> : vector<64x128xf32>
    %9 = tpu.matmul %7, %8, %cst_8 {dimension_numbers = #tpu.dot_dimension_numbers<[1], [0], [0], [1], [0, 0, 1, 1], [], []>} : vector<64x128xf32>, vector<128x128xf32>, vector<64x128xf32> -> vector<64x128xf32>
    %c0_9 = arith.constant 0 : index
    %c0_10 = arith.constant 0 : index
    %10 = vector.load %arg4[%c0_9, %c0_10] : memref<1x128xf32, #tpu.memory_space<vmem>>, vector<1x128xf32>
    %11 = vector.broadcast %10 : vector<1x128xf32> to vector<64x128xf32>
    %12 = arith.addf %9, %11 : vector<64x128xf32>
    %c0_11 = arith.constant 0 : index
    %c0_12 = arith.constant 0 : index
    %13 = vector.load %arg5[%c0_11, %c0_12] : memref<64x64xbf16, #tpu.memory_space<vmem>>, vector<64x64xbf16>
    %cst_13 = arith.constant 1.000000e-01 : f32
    %14 = vector.broadcast %cst_13 : f32 to vector<64x128xf32>
    %15 = arith.mulf %14, %12 : vector<64x128xf32>
    %c0_i32 = arith.constant 0 : i32
    %16 = arith.truncf %12 : vector<64x128xf32> to vector<64x128xbf16>
    %cst_14 = arith.constant dense<0.000000e+00> : vector<64x128xf32>
    %17 = tpu.matmul %13, %16, %cst_14 {dimension_numbers = #tpu.dot_dimension_numbers<[1], [0], [0], [1], [0, 0, 1, 1], [], []>} : vector<64x64xbf16>, vector<64x128xbf16>, vector<64x128xf32> -> vector<64x128xf32>
    %18 = arith.addf %17, %15 : vector<64x128xf32>
    %c1_i32 = arith.constant 1 : i32
    %19 = arith.truncf %18 : vector<64x128xf32> to vector<64x128xbf16>
    %cst_15 = arith.constant dense<0.000000e+00> : vector<64x128xf32>
    %20 = tpu.matmul %13, %19, %cst_15 {dimension_numbers = #tpu.dot_dimension_numbers<[1], [0], [0], [1], [0, 0, 1, 1], [], []>} : vector<64x64xbf16>, vector<64x128xbf16>, vector<64x128xf32> -> vector<64x128xf32>
    %21 = arith.addf %20, %15 : vector<64x128xf32>
    %c2_i32 = arith.constant 2 : i32
    %22 = arith.truncf %21 : vector<64x128xf32> to vector<64x128xbf16>
    %cst_16 = arith.constant dense<0.000000e+00> : vector<64x128xf32>
    %23 = tpu.matmul %13, %22, %cst_16 {dimension_numbers = #tpu.dot_dimension_numbers<[1], [0], [0], [1], [0, 0, 1, 1], [], []>} : vector<64x64xbf16>, vector<64x128xbf16>, vector<64x128xf32> -> vector<64x128xf32>
    %24 = arith.addf %23, %15 : vector<64x128xf32>
    %c3_i32 = arith.constant 3 : i32
    %25 = arith.truncf %24 : vector<64x128xf32> to vector<64x128xbf16>
    %cst_17 = arith.constant dense<0.000000e+00> : vector<64x128xf32>
    %26 = tpu.matmul %13, %25, %cst_17 {dimension_numbers = #tpu.dot_dimension_numbers<[1], [0], [0], [1], [0, 0, 1, 1], [], []>} : vector<64x64xbf16>, vector<64x128xbf16>, vector<64x128xf32> -> vector<64x128xf32>
    %27 = arith.addf %26, %15 : vector<64x128xf32>
    %c4_i32 = arith.constant 4 : i32
    %28 = arith.truncf %27 : vector<64x128xf32> to vector<64x128xbf16>
    %cst_18 = arith.constant dense<0.000000e+00> : vector<64x128xf32>
    %29 = tpu.matmul %13, %28, %cst_18 {dimension_numbers = #tpu.dot_dimension_numbers<[1], [0], [0], [1], [0, 0, 1, 1], [], []>} : vector<64x64xbf16>, vector<64x128xbf16>, vector<64x128xf32> -> vector<64x128xf32>
    %30 = arith.addf %29, %15 : vector<64x128xf32>
    %c5_i32 = arith.constant 5 : i32
    %31 = arith.truncf %30 : vector<64x128xf32> to vector<64x128xbf16>
    %cst_19 = arith.constant dense<0.000000e+00> : vector<64x128xf32>
    %32 = tpu.matmul %13, %31, %cst_19 {dimension_numbers = #tpu.dot_dimension_numbers<[1], [0], [0], [1], [0, 0, 1, 1], [], []>} : vector<64x64xbf16>, vector<64x128xbf16>, vector<64x128xf32> -> vector<64x128xf32>
    %33 = arith.addf %32, %15 : vector<64x128xf32>
    %c6_i32 = arith.constant 6 : i32
    %34 = arith.truncf %33 : vector<64x128xf32> to vector<64x128xbf16>
    %cst_20 = arith.constant dense<0.000000e+00> : vector<64x128xf32>
    %35 = tpu.matmul %13, %34, %cst_20 {dimension_numbers = #tpu.dot_dimension_numbers<[1], [0], [0], [1], [0, 0, 1, 1], [], []>} : vector<64x64xbf16>, vector<64x128xbf16>, vector<64x128xf32> -> vector<64x128xf32>
    %36 = arith.addf %35, %15 : vector<64x128xf32>
    %c7_i32 = arith.constant 7 : i32
    %37 = arith.truncf %36 : vector<64x128xf32> to vector<64x128xbf16>
    %cst_21 = arith.constant dense<0.000000e+00> : vector<64x128xf32>
    %38 = tpu.matmul %13, %37, %cst_21 {dimension_numbers = #tpu.dot_dimension_numbers<[1], [0], [0], [1], [0, 0, 1, 1], [], []>} : vector<64x64xbf16>, vector<64x128xbf16>, vector<64x128xf32> -> vector<64x128xf32>
    %39 = arith.addf %38, %15 : vector<64x128xf32>
    %c8_i32 = arith.constant 8 : i32
    %40 = arith.truncf %39 : vector<64x128xf32> to vector<64x128xbf16>
    %cst_22 = arith.constant dense<0.000000e+00> : vector<64x128xf32>
    %41 = tpu.matmul %13, %40, %cst_22 {dimension_numbers = #tpu.dot_dimension_numbers<[1], [0], [0], [1], [0, 0, 1, 1], [], []>} : vector<64x64xbf16>, vector<64x128xbf16>, vector<64x128xf32> -> vector<64x128xf32>
    %42 = arith.addf %41, %15 : vector<64x128xf32>
    %c9_i32 = arith.constant 9 : i32
    %43 = arith.truncf %42 : vector<64x128xf32> to vector<64x128xbf16>
    %cst_23 = arith.constant dense<0.000000e+00> : vector<64x128xf32>
    %44 = tpu.matmul %13, %43, %cst_23 {dimension_numbers = #tpu.dot_dimension_numbers<[1], [0], [0], [1], [0, 0, 1, 1], [], []>} : vector<64x64xbf16>, vector<64x128xbf16>, vector<64x128xf32> -> vector<64x128xf32>
    %45 = arith.addf %44, %15 : vector<64x128xf32>
    %46 = tpu.iota {dimensions = array<i32: 1>} : vector<64x128xi32>
    %c8_i32_24 = arith.constant 8 : i32
    %47 = vector.broadcast %c8_i32_24 : i32 to vector<64x128xi32>
    %48 = arith.cmpi slt, %46, %47 : vector<64x128xi32>
    %cst_25 = arith.constant 0xFF800000 : f32
    %49 = vector.broadcast %cst_25 : f32 to vector<64x128xf32>
    %50 = arith.select %48, %45, %49 : vector<64x128xi1>, vector<64x128xf32>
    %cst_26 = arith.constant dense<0xFF800000> : vector<64xf32>
    %51 = vector.multi_reduction <maximumf>, %50, %cst_26 [1] : vector<64x128xf32> to vector<64xf32>
    %52 = vector.shape_cast %51 : vector<64xf32> to vector<64x1xf32>
    %53 = vector.broadcast %52 : vector<64x1xf32> to vector<64x128xf32>
    %54 = arith.subf %50, %53 : vector<64x128xf32>
    %55 = math.exp %54 : vector<64x128xf32>
    %cst_27 = arith.constant 0.000000e+00 : f32
    %56 = vector.broadcast %cst_27 : f32 to vector<64x128xf32>
    %57 = arith.select %48, %55, %56 : vector<64x128xi1>, vector<64x128xf32>
    %cst_28 = arith.constant dense<0.000000e+00> : vector<64xf32>
    %58 = vector.multi_reduction <add>, %57, %cst_28 [1] : vector<64x128xf32> to vector<64xf32>
    %59 = vector.shape_cast %58 : vector<64xf32> to vector<64x1xf32>
    %60 = math.log %59 : vector<64x1xf32>
    %61 = vector.broadcast %60 : vector<64x1xf32> to vector<64x128xf32>
    %62 = arith.subf %54, %61 : vector<64x128xf32>
    %cst_29 = arith.constant 0.000000e+00 : f32
    %63 = vector.broadcast %cst_29 : f32 to vector<64x128xf32>
    %64 = arith.select %48, %62, %63 : vector<64x128xi1>, vector<64x128xf32>
    %c0_30 = arith.constant 0 : index
    %c0_31 = arith.constant 0 : index
    %65 = vector.load %arg6[%c0_30, %c0_31] : memref<64x128xf32, #tpu.memory_space<vmem>>, vector<64x128xf32>
    tpu.vector_store %arg6[%c0_30, %c0_31], %64 {strides = array<i32>} : memref<64x128xf32, #tpu.memory_space<vmem>>, vector<64x128xf32>,
    return
  }
}

</mosaic_0001>

<bundles_post_ra>
// kernel: tpu_custom_call.1
= control target key start
LH: loop header
LB: loop body
LE: loop exit
PB: predicated region body
PF: predicated region fallthrough
CT: control target
= control target key end

     0   :  { %11 = vsyncpa [#allocation3], 0  ;;  %s2097_s0 = inlined_call_operand.vmem [shape: f32[64,16], index: 0, kind: input, shape index: {}]   ;;  %s2098_s1 = inlined_call_operand.vmem [shape: f32[16,128], index: 1, kind: input, shape index: {}]   ;;  %s2099_s2 = inlined_call_operand.vmem [shape: f32[1,128], index: 2, kind: input, shape index: {}]   ;;  %s2100_s3 = inlined_call_operand.hbm [shape: f32[128,128], index: 3, kind: input, shape index: {}]   ;;  %s2101_s4 = inlined_call_operand.vmem [shape: f32[1,128], index: 4, kind: input, shape index: {}]   ;;  %s2102_s5 = inlined_call_operand.vmem [shape: bf16[64,64], index: 5, kind: input, shape index: {}]   ;;  %s2103_s6 = inlined_call_operand.hbm [shape: f32[64,128], index: 6, kind: output, shape index: {}]  }
   0x1   :  { %12 = vsyncpa [#allocation4], 0  ;;  %s1705_s21 = smov [#allocation2]   ;;  %s1657_s25 = scalar_lea.hbm %s2100_s3, 2048 }
   0x2   :  { %s24_s22 = sshll.u32 %s1705_s21, 4  ;;  %p1658_p0 = scmp.ne.s32.totalorder %s2100_s3, %s1657_s25  ;;  %s25_s22 = int_to_ptr.vmem [resolvable:$true] %s24_s22 }
   0x3   :  { %p1661_p1 = scmp.lt.u32.totalorder %s1657_s25, %s2100_s3 }
   0x5   :  { %p1663_p2 = pnand %p1661_p1, %p1658_p0 }
   0x7   :  { %1666 = shalt.err (!%p1663_p2)
}
   0x8   :  { %s1667_s30 = scalar_lea.vmem %s25_s22, 2048  ;;  %p1672_p4 = scmp.lt.s32.totalorder %s25_s22, %s25_s22 }
   0x9   :  { %p1668_p3 = scmp.ne.s32.totalorder %s25_s22, %s1667_s30  ;;  %p1673_p5 = scmp.lt.s32.totalorder %s1667_s30, %s1667_s30 }
   0xb   :  { %p1674_p6 = por %p1673_p5, %p1672_p4 }
   0xd   :  { %p1675_p7 = pnand %p1674_p6, %p1668_p3 }
   0xf   :  { %1678 = shalt.err (!%p1675_p7)
}
  0x10   :  { %s1706_s7 = smov 128   ;;  %s1707_s8 = smov 8  }
  0x11   :  { %30 = dma.hbm_to_vmem [thread:$0]  %s2100_s3, 2048, %s25_s22, [#allocation3], %s1706_s7, %s1706_s7, %s1707_s8  }
  0x12   :  { %1701 = dma.done.wait [#allocation3], 2048  }
  0x13   :  { %1702 = vsyncadd [#allocation3], 4294965248  ;;  %vm56_vm0 = vcmask 130048   ;;  %v47_v0 = vld [vmem:[%s2098_s1] sm:$0xff]  ;;  %v48_v1 = vld [vmem:[%s2098_s1 + $0x8] sm:$0xff]  ;;  %vm362_vm1 = vcmask 523264  }
  0x14   :  { %v39_v2 = vld [vmem:[%s2097_s0] sm:$0xff]  ;;  %v1581_v3 = vpack.c.bf16 %v48_v1, %v47_v0  ;;  %v195_v5 = vld [vmem:[#allocation2 + $0x8] sm:$0xff]  ;;  %v196_v8 = vld [vmem:[#allocation2 + $0x10] sm:$0xff] }
  0x15   :  { %1365 = vmatprep.mubr.msk.f32.mxu0 %vm56_vm0, %v39_v2  ;;  %v194_v4 = vld [vmem:[#allocation2] sm:$0xff]  ;;  %v40_v6 = vld [vmem:[%s2097_s0 + $0x8] sm:$0xff]  ;;  %v197_v9 = vld [vmem:[#allocation2 + $0x18] sm:$0xff] }
  0x16   :  { %1582 = vmatprep.subr.bf16.mxu0 %v1581_v3  ;;  %v1585_v7 = vpack.c.bf16 %v195_v5, %v194_v4  ;;  %v41_v10 = vld [vmem:[%s2097_s0 + $0x10] sm:$0xff]  ;;  %v1589_v11 = vpack.c.bf16 %v197_v9, %v196_v8  ;;  %v198_v12 = vld [vmem:[#allocation2 + $0x20] sm:$0xff]  ;;  %v199_v13 = vld [vmem:[#allocation2 + $0x28] sm:$0xff] }
  0x17   :  { %1584 = vmatpush3.bf16.msra.mxu0 %v1581_v3  ;;  %v42_v14 = vld [vmem:[%s2097_s0 + $0x18] sm:$0xff]  ;;  %v43_v15 = vld [vmem:[%s2097_s0 + $0x20] sm:$0xff]  ;;  %v200_v16 = vld [vmem:[#allocation2 + $0x30] sm:$0xff]  ;;  %v1593_v18 = vpack.c.bf16 %v199_v13, %v198_v12 }
  0x18   :  { %1586 = vmatprep.subr.bf16.mxu1 %v1585_v7  ;;  %v201_v17 = vld [vmem:[#allocation2 + $0x38] sm:$0xff]  ;;  %v44_v19 = vld [vmem:[%s2097_s0 + $0x28] sm:$0xff]  ;;  %v45_v21 = vld [vmem:[%s2097_s0 + $0x30] sm:$0xff] }
  0x19   :  { %1588 = vmatpush3.bf16.msra.mxu1 %v1585_v7  ;;  %v1597_v20 = vpack.c.bf16 %v201_v17, %v200_v16  ;;  %v202_v22 = vld [vmem:[#allocation2 + $0x40] sm:$0xff]  ;;  %v203_v23 = vld [vmem:[#allocation2 + $0x48] sm:$0xff]  ;;  %v46_v24 = vld [vmem:[%s2097_s0 + $0x38] sm:$0xff] }
  0x1a   :  { %1366 = vmatmul.mubr.msk.f32.vlgmr.msra.gmra.mrb[0].mxu0 %vm56_vm0, %v40_v6  ;;  %1590 = vmatprep.subr.bf16.mxu1 %v1589_v11  ;;  %v1601_v25 = vpack.c.bf16 %v203_v23, %v202_v22  ;;  %v204_v26 = vld [vmem:[#allocation2 + $0x50] sm:$0xff]  ;;  %v205_v27 = vld [vmem:[#allocation2 + $0x58] sm:$0xff]  ;;  %v206_v29 = vld [vmem:[#allocation2 + $0x60] sm:$0xff] }
  0x1b   :  { %1368 = vmatprep.mubr.msk.f32.mxu0 %vm56_vm0, %v41_v10  ;;  %v1605_v28 = vpack.c.bf16 %v205_v27, %v204_v26  ;;  %v207_v30 = vld [vmem:[#allocation2 + $0x68] sm:$0xff]  ;;  %v208_v32 = vld [vmem:[#allocation2 + $0x70] sm:$0xff]  ;;  %v209_v33 = vld [vmem:[#allocation2 + $0x78] sm:$0xff] }
  0x1c   :  { %v1609_v31 = vpack.c.bf16 %v207_v30, %v206_v29  ;;  %v1613_v34 = vpack.c.bf16 %v209_v33, %v208_v32  ;;  %v1193_v35 = vld [vmem:[%s2099_s2] ss:$0 sm:$0xff] }
  0x1d   :  { %1592 = vmatpush3.bf16.msra.mxu1 %v1589_v11  ;;  %v1803_v60 = vld [vmem:[%s2102_s5] sm:$0xff]  }
  0x1e   :  { %1369 = vmatmul.mubr.msk.f32.gmra.mrb[2].mxu0 %vm56_vm0, %v42_v14  ;;  %1594 = vmatprep.subr.bf16.mxu1 %v1593_v18  ;;  %v1202_v61 = vld [vmem:[%s2101_s4] ss:$0 sm:$0xff] }
  0x1f   :  { %1371 = vmatprep.mubr.msk.f32.mxu0 %vm56_vm0, %v43_v15 }
  0x21   :  { %1596 = vmatpush3.bf16.msra.mxu1 %v1593_v18  ;;  %v1815_v18 = vld [vmem:[%s2102_s5 + $0x8] sm:$0xff]  }
  0x22   :  { %1372 = vmatmul.mubr.msk.f32.gmra.mrb[4].mxu0 %vm56_vm0, %v44_v19  ;;  %1598 = vmatprep.subr.bf16.mxu1 %v1597_v20  ;;  %v1820_v19 = vld [vmem:[%s2102_s5 + $0x10] sm:$0xff]  }
  0x23   :  { %1374 = vmatprep.mubr.msk.f32.mxu0 %vm56_vm0, %v45_v21 }
  0x25   :  { %1600 = vmatpush3.bf16.msra.mxu1 %v1597_v20  ;;  %v1829_v20 = vld [vmem:[%s2102_s5 + $0x18] sm:$0xff]   ;;  %s1708_s5 = smov [#allocation5]  }
  0x26   :  { %1375 = vmatmul.mubr.msk.f32.gmra.mrb[6].mxu0 %vm56_vm0, %v46_v24  ;;  %1602 = vmatprep.subr.bf16.mxu1 %v1601_v25  ;;  %s1181_s16 = sshll.u32 %s1708_s5, 4  ;;  %s1182_s16 = int_to_ptr.vmem [resolvable:$true] %s1181_s16 }
  0x27   :  { %1429 = vmatprep.mubr.msk.bf16.mxu0 %vm362_vm1, %v1803_v60  ;;  %s1679_s3 = scalar_lea.vmem %s1182_s16, 1024  ;;  %p1684_p9 = scmp.lt.s32.totalorder %s1182_s16, %s1182_s16 }
  0x28   :  { %p1680_p8 = scmp.ne.s32.totalorder %s1182_s16, %s1679_s3  ;;  %p1685_p10 = scmp.lt.s32.totalorder %s1679_s3, %s1679_s3 }
  0x29   :  { %1604 = vmatpush3.bf16.msra.mxu1 %v1601_v25 }
  0x2a   :  { %1606 = vmatprep.subr.bf16.mxu1 %v1605_v28  ;;  %p1686_p11 = por %p1685_p10, %p1684_p9 }
  0x2c   :  { %p1687_p12 = pnand %p1686_p11, %p1680_p8 }
  0x2d   :  { %1608 = vmatpush3.bf16.msra.mxu1 %v1605_v28 }
  0x2e   :  { %1610 = vmatprep.subr.bf16.mxu1 %v1609_v31 }
  0x31   :  { %1612 = vmatpush3.bf16.msra.mxu1 %v1609_v31 }
  0x32   :  { %1614 = vmatprep.subr.bf16.mxu1 %v1613_v34 }
  0x35   :  { %1616 = vmatpush3.bf16.msra.mxu1 %v1613_v34 }
  0xed   :  { %v1367_v36 = vpop.f32.mrb[0].mxu0 }
  0xee   :  { %v153_v37 = vadd.f32 %v1367_v36, %v1193_v35  ;;  %v147_v38 = vpop.f32.mrb[1].mxu0 }
  0xef   :  { %v148_v39 = vadd.f32 %v1193_v35, %v147_v38 }
  0xf0   :  { %v187_v42 = vmax.f32 %v153_v37, 0.0 }
  0xf1   :  { %v1370_v40 = vpop.f32.mrb[2].mxu0  ;;  %v186_v41 = vmax.f32 %v148_v39, 0.0 }
  0xf2   :  { %v163_v43 = vadd.f32 %v1370_v40, %v1193_v35  ;;  %v157_v44 = vpop.f32.mrb[3].mxu0 }
  0xf3   :  { %v158_v45 = vadd.f32 %v1193_v35, %v157_v44  ;;  %1409 = vmatprep.mubr.f32.mxu1 %v186_v41 }
  0xf4   :  { %1410 = vmatmul.mubr.f32.vlgmr.msra.gmra.mrb[0].mxu1 %v187_v42  ;;  %v189_v48 = vmax.f32 %v163_v43, 0.0 }
  0xf5   :  { %v188_v46 = vmax.f32 %v158_v45, 0.0  ;;  %v1373_v47 = vpop.f32.mrb[4].mxu0 }
  0xf6   :  { %v173_v49 = vadd.f32 %v1373_v47, %v1193_v35  ;;  %v167_v50 = vpop.f32.mrb[5].mxu0 }
  0xf7   :  { %v168_v51 = vadd.f32 %v1193_v35, %v167_v50  ;;  %1412 = vmatprep.mubr.f32.mxu1 %v188_v46 }
  0xf8   :  { %1413 = vmatmul.mubr.f32.gmra.mrb[2].mxu1 %v189_v48  ;;  %v191_v54 = vmax.f32 %v173_v49, 0.0 }
  0xf9   :  { %v190_v52 = vmax.f32 %v168_v51, 0.0  ;;  %v1376_v53 = vpop.f32.mrb[6].mxu0 }
  0xfa   :  { %v183_v55 = vadd.f32 %v1376_v53, %v1193_v35  ;;  %v177_v56 = vpop.f32.mrb[7].mxu0 }
  0xfb   :  { %v178_v57 = vadd.f32 %v1193_v35, %v177_v56  ;;  %1415 = vmatprep.mubr.f32.mxu1 %v190_v52 }
  0xfc   :  { %1416 = vmatmul.mubr.f32.gmra.mrb[4].mxu1 %v191_v54  ;;  %v193_v59 = vmax.f32 %v183_v55, 0.0 }
  0xfd   :  { %v192_v58 = vmax.f32 %v178_v57, 0.0 }
  0xff   :  { %1418 = vmatprep.mubr.f32.mxu1 %v192_v58 }
 0x100   :  { %1419 = vmatmul.mubr.f32.gmra.mrb[6].mxu1 %v193_v59 }
 0x101   :  { %1461 = vmatprep.mubr.msk.bf16.mxu1 %vm362_vm1, %v1803_v60 }
 0x1c7   :  { %v1411_v62 = vpop.f32.mrb[0].mxu1 }
 0x1c8   :  { %v289_v63 = vadd.f32 %v1411_v62, %v1202_v61  ;;  %v283_v0 = vpop.f32.mrb[1].mxu1 }
 0x1c9   :  { %v284_v1 = vadd.f32 %v1202_v61, %v283_v0 }
 0x1ca   :  { %v1839_v25 = vmul.f32 0.1, %v289_v63 }
 0x1cb   :  { %v338_v2 = vpack.c.bf16 %v289_v63, %v284_v1  ;;  %v1414_v3 = vpop.f32.mrb[2].mxu1  ;;  %v1841_v26 = vmul.f32 0.1, %v284_v1 }
 0x1cc   :  { %v299_v4 = vadd.f32 %v1414_v3, %v1202_v61  ;;  %v293_v5 = vpop.f32.mrb[3].mxu1 }
 0x1cd   :  { %v294_v6 = vadd.f32 %v1202_v61, %v293_v5  ;;  %1421 = vmatprep.subr.bf16.mxu0 %v338_v2 }
 0x1ce   :  { %1422 = vmatpush3.bf16.msra.mxu0 %v338_v2  ;;  %v1835_v22 = vmul.f32 0.1, %v299_v4 }
 0x1cf   :  { %v339_v7 = vpack.c.bf16 %v299_v4, %v294_v6  ;;  %v1417_v8 = vpop.f32.mrb[4].mxu1  ;;  %v1837_v23 = vmul.f32 0.1, %v294_v6 }
 0x1d0   :  { %v309_v9 = vadd.f32 %v1417_v8, %v1202_v61  ;;  %v303_v10 = vpop.f32.mrb[5].mxu1 }
 0x1d1   :  { %v304_v11 = vadd.f32 %v1202_v61, %v303_v10  ;;  %1423 = vmatprep.subr.bf16.mxu0 %v339_v7 }
 0x1d2   :  { %1424 = vmatpush3.bf16.msra.mxu0 %v339_v7  ;;  %v1851_v39 = vmul.f32 0.1, %v309_v9 }
 0x1d3   :  { %v340_v12 = vpack.c.bf16 %v309_v9, %v304_v11  ;;  %v1420_v13 = vpop.f32.mrb[6].mxu1  ;;  %v1853_v40 = vmul.f32 0.1, %v304_v11 }
 0x1d4   :  { %v319_v14 = vadd.f32 %v1420_v13, %v1202_v61  ;;  %v313_v15 = vpop.f32.mrb[7].mxu1 }
 0x1d5   :  { %v314_v16 = vadd.f32 %v1202_v61, %v313_v15  ;;  %1425 = vmatprep.subr.bf16.mxu0 %v340_v12 }
 0x1d6   :  { %1426 = vmatpush3.bf16.msra.mxu0 %v340_v12  ;;  %v1847_v36 = vmul.f32 0.1, %v319_v14 }
 0x1d7   :  { %v341_v17 = vpack.c.bf16 %v319_v14, %v314_v16  ;;  %v1849_v37 = vmul.f32 0.1, %v314_v16 }
 0x1d9   :  { %1427 = vmatprep.subr.bf16.mxu0 %v341_v17 }
 0x1da   :  { %1428 = vmatpush3.bf16.msra.mxu0 %v341_v17 }
 0x1dd   :  { %1430 = vmatmul.mubr.msk.bf16.vlgmr.msra.gmra.mrb[8].mxu0 %vm362_vm1, %v1815_v18 }
 0x1de   :  { %1433 = vmatprep.mubr.msk.bf16.mxu0 %vm362_vm1, %v1820_v19 }
 0x1e5   :  { %1434 = vmatmul.mubr.msk.bf16.gmra.mrb[12].mxu0 %vm362_vm1, %v1829_v20 }
 0x1e6   :  { %1445 = vmatprep.mubr.msk.bf16.mxu0 %vm362_vm1, %v1803_v60 }
 0x2b0   :  { %v1431_v21 = vpop.f32.mrb[8].mxu0 }
 0x2b1   :  { %v409_v24 = vpop.f32.mrb[9].mxu0  ;;  %v418_v28 = vadd.f32 %v1431_v21, %v1837_v23 }
 0x2b2   :  { %v1432_v27 = vpop.f32.mrb[10].mxu0  ;;  %v410_v31 = vadd.f32 %v409_v24, %v1841_v26 }
 0x2b3   :  { %v421_v29 = vadd.f32 %v1432_v27, %v1835_v22  ;;  %v412_v30 = vpop.f32.mrb[11].mxu0 }
 0x2b4   :  { %v413_v32 = vadd.f32 %v412_v30, %v1839_v25 }
 0x2b5   :  { %v441_v33 = vpack.c.bf16 %v421_v29, %v418_v28 }
 0x2b6   :  { %v440_v34 = vpack.c.bf16 %v413_v32, %v410_v31 }
 0x2b8   :  { %v1435_v35 = vpop.f32.mrb[12].mxu0  ;;  %1437 = vmatprep.subr.bf16.mxu0 %v440_v34 }
 0x2b9   :  { %v425_v38 = vpop.f32.mrb[13].mxu0  ;;  %1438 = vmatpush3.bf16.msra.mxu0 %v440_v34  ;;  %v434_v42 = vadd.f32 %v1435_v35, %v1849_v37 }
 0x2ba   :  { %v1436_v41 = vpop.f32.mrb[14].mxu0  ;;  %1439 = vmatprep.subr.bf16.mxu0 %v441_v33  ;;  %v426_v45 = vadd.f32 %v425_v38, %v1853_v40 }
 0x2bb   :  { %v437_v43 = vadd.f32 %v1436_v41, %v1847_v36  ;;  %v428_v44 = vpop.f32.mrb[15].mxu0 }
 0x2bc   :  { %v429_v46 = vadd.f32 %v428_v44, %v1851_v39 }
 0x2bd   :  { %v443_v47 = vpack.c.bf16 %v437_v43, %v434_v42  ;;  %1440 = vmatpush3.bf16.msra.mxu0 %v441_v33 }
 0x2be   :  { %v442_v48 = vpack.c.bf16 %v429_v46, %v426_v45 }
 0x2c0   :  { %1441 = vmatprep.subr.bf16.mxu0 %v442_v48 }
 0x2c1   :  { %1442 = vmatpush3.bf16.msra.mxu0 %v442_v48 }
 0x2c2   :  { %1443 = vmatprep.subr.bf16.mxu0 %v443_v47 }
 0x2c5   :  { %1444 = vmatpush3.bf16.msra.mxu0 %v443_v47 }
 0x2c8   :  { %1446 = vmatmul.mubr.msk.bf16.vlgmr.msra.gmra.mrb[16].mxu0 %vm362_vm1, %v1815_v18 }
 0x2c9   :  { %1449 = vmatprep.mubr.msk.bf16.mxu0 %vm362_vm1, %v1820_v19 }
 0x2d0   :  { %1450 = vmatmul.mubr.msk.bf16.gmra.mrb[20].mxu0 %vm362_vm1, %v1829_v20 }
 0x2d1   :  { %1477 = vmatprep.mubr.msk.bf16.mxu0 %vm362_vm1, %v1803_v60 }
 0x39b   :  { %v1447_v49 = vpop.f32.mrb[16].mxu0 }
 0x39c   :  { %v478_v50 = vpop.f32.mrb[17].mxu0  ;;  %v487_v52 = vadd.f32 %v1447_v49, %v1837_v23 }
 0x39d   :  { %v1448_v51 = vpop.f32.mrb[18].mxu0  ;;  %v479_v55 = vadd.f32 %v478_v50, %v1841_v26 }
 0x39e   :  { %v490_v53 = vadd.f32 %v1448_v51, %v1835_v22  ;;  %v481_v54 = vpop.f32.mrb[19].mxu0 }
 0x39f   :  { %v482_v56 = vadd.f32 %v481_v54, %v1839_v25 }
 0x3a0   :  { %v510_v57 = vpack.c.bf16 %v490_v53, %v487_v52 }
 0x3a1   :  { %v509_v58 = vpack.c.bf16 %v482_v56, %v479_v55 }
 0x3a3   :  { %v1451_v59 = vpop.f32.mrb[20].mxu0  ;;  %1453 = vmatprep.subr.bf16.mxu1 %v509_v58 }
 0x3a4   :  { %v494_v61 = vpop.f32.mrb[21].mxu0  ;;  %1454 = vmatpush3.bf16.msra.mxu1 %v509_v58  ;;  %v503_v63 = vadd.f32 %v1451_v59, %v1849_v37 }
 0x3a5   :  { %v1452_v62 = vpop.f32.mrb[22].mxu0  ;;  %1455 = vmatprep.subr.bf16.mxu1 %v510_v57  ;;  %v495_v2 = vadd.f32 %v494_v61, %v1853_v40 }
 0x3a6   :  { %v506_v0 = vadd.f32 %v1452_v62, %v1847_v36  ;;  %v497_v1 = vpop.f32.mrb[23].mxu0 }
 0x3a7   :  { %v498_v3 = vadd.f32 %v497_v1, %v1851_v39 }
 0x3a8   :  { %v512_v4 = vpack.c.bf16 %v506_v0, %v503_v63  ;;  %1456 = vmatpush3.bf16.msra.mxu1 %v510_v57 }
 0x3a9   :  { %v511_v5 = vpack.c.bf16 %v498_v3, %v495_v2 }
 0x3ab   :  { %1457 = vmatprep.subr.bf16.mxu1 %v511_v5 }
 0x3ac   :  { %1458 = vmatpush3.bf16.msra.mxu1 %v511_v5 }
 0x3ad   :  { %1459 = vmatprep.subr.bf16.mxu1 %v512_v4 }
 0x3b0   :  { %1460 = vmatpush3.bf16.msra.mxu1 %v512_v4 }
 0x3b3   :  { %1462 = vmatmul.mubr.msk.bf16.vlgmr.msra.gmra.mrb[8].mxu1 %vm362_vm1, %v1815_v18 }
 0x3b4   :  { %1465 = vmatprep.mubr.msk.bf16.mxu1 %vm362_vm1, %v1820_v19 }
 0x3bb   :  { %1466 = vmatmul.mubr.msk.bf16.gmra.mrb[12].mxu1 %vm362_vm1, %v1829_v20 }
 0x3bc   :  { %1493 = vmatprep.mubr.msk.bf16.mxu1 %vm362_vm1, %v1803_v60 }
 0x486   :  { %v1463_v6 = vpop.f32.mrb[8].mxu1 }
 0x487   :  { %v547_v7 = vpop.f32.mrb[9].mxu1  ;;  %v556_v9 = vadd.f32 %v1463_v6, %v1837_v23 }
 0x488   :  { %v1464_v8 = vpop.f32.mrb[10].mxu1  ;;  %v548_v12 = vadd.f32 %v547_v7, %v1841_v26 }
 0x489   :  { %v559_v10 = vadd.f32 %v1464_v8, %v1835_v22  ;;  %v550_v11 = vpop.f32.mrb[11].mxu1 }
 0x48a   :  { %v551_v13 = vadd.f32 %v550_v11, %v1839_v25 }
 0x48b   :  { %v579_v14 = vpack.c.bf16 %v559_v10, %v556_v9 }
 0x48c   :  { %v578_v15 = vpack.c.bf16 %v551_v13, %v548_v12 }
 0x48e   :  { %v1467_v16 = vpop.f32.mrb[12].mxu1  ;;  %1469 = vmatprep.subr.bf16.mxu0 %v578_v15 }
 0x48f   :  { %v563_v17 = vpop.f32.mrb[13].mxu1  ;;  %1470 = vmatpush3.bf16.msra.mxu0 %v578_v15  ;;  %v572_v24 = vadd.f32 %v1467_v16, %v1849_v37 }
 0x490   :  { %v1468_v21 = vpop.f32.mrb[14].mxu1  ;;  %1471 = vmatprep.subr.bf16.mxu0 %v579_v14  ;;  %v564_v29 = vadd.f32 %v563_v17, %v1853_v40 }
 0x491   :  { %v575_v27 = vadd.f32 %v1468_v21, %v1847_v36  ;;  %v566_v28 = vpop.f32.mrb[15].mxu1 }
 0x492   :  { %v567_v30 = vadd.f32 %v566_v28, %v1851_v39 }
 0x493   :  { %v581_v31 = vpack.c.bf16 %v575_v27, %v572_v24  ;;  %1472 = vmatpush3.bf16.msra.mxu0 %v579_v14 }
 0x494   :  { %v580_v32 = vpack.c.bf16 %v567_v30, %v564_v29 }
 0x496   :  { %1473 = vmatprep.subr.bf16.mxu0 %v580_v32 }
 0x497   :  { %1474 = vmatpush3.bf16.msra.mxu0 %v580_v32 }
 0x498   :  { %1475 = vmatprep.subr.bf16.mxu0 %v581_v31 }
 0x49b   :  { %1476 = vmatpush3.bf16.msra.mxu0 %v581_v31 }
 0x49e   :  { %1478 = vmatmul.mubr.msk.bf16.vlgmr.msra.gmra.mrb[24].mxu0 %vm362_vm1, %v1815_v18 }
 0x49f   :  { %1481 = vmatprep.mubr.msk.bf16.mxu0 %vm362_vm1, %v1820_v19 }
 0x4a6   :  { %1482 = vmatmul.mubr.msk.bf16.gmra.mrb[28].mxu0 %vm362_vm1, %v1829_v20 }
 0x4a7   :  { %1509 = vmatprep.mubr.msk.bf16.mxu0 %vm362_vm1, %v1803_v60 }
 0x571   :  { %v1479_v33 = vpop.f32.mrb[24].mxu0 }
 0x572   :  { %v616_v34 = vpop.f32.mrb[25].mxu0  ;;  %v625_v38 = vadd.f32 %v1479_v33, %v1837_v23 }
 0x573   :  { %v1480_v35 = vpop.f32.mrb[26].mxu0  ;;  %v617_v43 = vadd.f32 %v616_v34, %v1841_v26 }
 0x574   :  { %v628_v41 = vadd.f32 %v1480_v35, %v1835_v22  ;;  %v619_v42 = vpop.f32.mrb[27].mxu0 }
 0x575   :  { %v620_v44 = vadd.f32 %v619_v42, %v1839_v25 }
 0x576   :  { %v648_v45 = vpack.c.bf16 %v628_v41, %v625_v38 }
 0x577   :  { %v647_v46 = vpack.c.bf16 %v620_v44, %v617_v43 }
 0x579   :  { %v1483_v47 = vpop.f32.mrb[28].mxu0  ;;  %1485 = vmatprep.subr.bf16.mxu1 %v647_v46 }
 0x57a   :  { %v632_v48 = vpop.f32.mrb[29].mxu0  ;;  %1486 = vmatpush3.bf16.msra.mxu1 %v647_v46  ;;  %v641_v50 = vadd.f32 %v1483_v47, %v1849_v37 }
 0x57b   :  { %v1484_v49 = vpop.f32.mrb[30].mxu0  ;;  %1487 = vmatprep.subr.bf16.mxu1 %v648_v45  ;;  %v633_v53 = vadd.f32 %v632_v48, %v1853_v40 }
 0x57c   :  { %v644_v51 = vadd.f32 %v1484_v49, %v1847_v36  ;;  %v635_v52 = vpop.f32.mrb[31].mxu0 }
 0x57d   :  { %v636_v54 = vadd.f32 %v635_v52, %v1851_v39 }
 0x57e   :  { %v650_v55 = vpack.c.bf16 %v644_v51, %v641_v50  ;;  %1488 = vmatpush3.bf16.msra.mxu1 %v648_v45 }
 0x57f   :  { %v649_v56 = vpack.c.bf16 %v636_v54, %v633_v53 }
 0x581   :  { %1489 = vmatprep.subr.bf16.mxu1 %v649_v56 }
 0x582   :  { %1490 = vmatpush3.bf16.msra.mxu1 %v649_v56 }
 0x583   :  { %1491 = vmatprep.subr.bf16.mxu1 %v650_v55 }
 0x586   :  { %1492 = vmatpush3.bf16.msra.mxu1 %v650_v55 }
 0x589   :  { %1494 = vmatmul.mubr.msk.bf16.vlgmr.msra.gmra.mrb[16].mxu1 %vm362_vm1, %v1815_v18 }
 0x58a   :  { %1497 = vmatprep.mubr.msk.bf16.mxu1 %vm362_vm1, %v1820_v19 }
 0x591   :  { %1498 = vmatmul.mubr.msk.bf16.gmra.mrb[20].mxu1 %vm362_vm1, %v1829_v20 }
 0x592   :  { %1525 = vmatprep.mubr.msk.bf16.mxu1 %vm362_vm1, %v1803_v60 }
 0x65c   :  { %v1495_v57 = vpop.f32.mrb[16].mxu1 }
 0x65d   :  { %v685_v58 = vpop.f32.mrb[17].mxu1  ;;  %v694_v61 = vadd.f32 %v1495_v57, %v1837_v23 }
 0x65e   :  { %v1496_v59 = vpop.f32.mrb[18].mxu1  ;;  %v686_v0 = vadd.f32 %v685_v58, %v1841_v26 }
 0x65f   :  { %v697_v62 = vadd.f32 %v1496_v59, %v1835_v22  ;;  %v688_v63 = vpop.f32.mrb[19].mxu1 }
 0x660   :  { %v689_v1 = vadd.f32 %v688_v63, %v1839_v25 }
 0x661   :  { %v717_v2 = vpack.c.bf16 %v697_v62, %v694_v61 }
 0x662   :  { %v716_v3 = vpack.c.bf16 %v689_v1, %v686_v0 }
 0x664   :  { %v1499_v4 = vpop.f32.mrb[20].mxu1  ;;  %1501 = vmatprep.subr.bf16.mxu0 %v716_v3 }
 0x665   :  { %v701_v5 = vpop.f32.mrb[21].mxu1  ;;  %1502 = vmatpush3.bf16.msra.mxu0 %v716_v3  ;;  %v710_v7 = vadd.f32 %v1499_v4, %v1849_v37 }
 0x666   :  { %v1500_v6 = vpop.f32.mrb[22].mxu1  ;;  %1503 = vmatprep.subr.bf16.mxu0 %v717_v2  ;;  %v702_v10 = vadd.f32 %v701_v5, %v1853_v40 }
 0x667   :  { %v713_v8 = vadd.f32 %v1500_v6, %v1847_v36  ;;  %v704_v9 = vpop.f32.mrb[23].mxu1 }
 0x668   :  { %v705_v11 = vadd.f32 %v704_v9, %v1851_v39 }
 0x669   :  { %v719_v12 = vpack.c.bf16 %v713_v8, %v710_v7  ;;  %1504 = vmatpush3.bf16.msra.mxu0 %v717_v2 }
 0x66a   :  { %v718_v13 = vpack.c.bf16 %v705_v11, %v702_v10 }
 0x66c   :  { %1505 = vmatprep.subr.bf16.mxu0 %v718_v13 }
 0x66d   :  { %1506 = vmatpush3.bf16.msra.mxu0 %v718_v13 }
 0x66e   :  { %1507 = vmatprep.subr.bf16.mxu0 %v719_v12 }
 0x671   :  { %1508 = vmatpush3.bf16.msra.mxu0 %v719_v12 }
 0x674   :  { %1510 = vmatmul.mubr.msk.bf16.vlgmr.msra.gmra.mrb[32].mxu0 %vm362_vm1, %v1815_v18 }
 0x675   :  { %1513 = vmatprep.mubr.msk.bf16.mxu0 %vm362_vm1, %v1820_v19 }
 0x67c   :  { %1514 = vmatmul.mubr.msk.bf16.gmra.mrb[36].mxu0 %vm362_vm1, %v1829_v20 }
 0x67d   :  { %1541 = vmatprep.mubr.msk.bf16.mxu0 %vm362_vm1, %v1803_v60 }
 0x747   :  { %v1511_v14 = vpop.f32.mrb[32].mxu0 }
 0x748   :  { %v754_v15 = vpop.f32.mrb[33].mxu0  ;;  %v763_v17 = vadd.f32 %v1511_v14, %v1837_v23 }
 0x749   :  { %v1512_v16 = vpop.f32.mrb[34].mxu0  ;;  %v755_v27 = vadd.f32 %v754_v15, %v1841_v26 }
 0x74a   :  { %v766_v21 = vadd.f32 %v1512_v16, %v1835_v22  ;;  %v757_v24 = vpop.f32.mrb[35].mxu0 }
 0x74b   :  { %v758_v28 = vadd.f32 %v757_v24, %v1839_v25 }
 0x74c   :  { %v786_v29 = vpack.c.bf16 %v766_v21, %v763_v17 }
 0x74d   :  { %v785_v30 = vpack.c.bf16 %v758_v28, %v755_v27 }
 0x74f   :  { %v1515_v31 = vpop.f32.mrb[36].mxu0  ;;  %1517 = vmatprep.subr.bf16.mxu1 %v785_v30 }
 0x750   :  { %v770_v32 = vpop.f32.mrb[37].mxu0  ;;  %1518 = vmatpush3.bf16.msra.mxu1 %v785_v30  ;;  %v779_v34 = vadd.f32 %v1515_v31, %v1849_v37 }
 0x751   :  { %v1516_v33 = vpop.f32.mrb[38].mxu0  ;;  %1519 = vmatprep.subr.bf16.mxu1 %v786_v29  ;;  %v771_v41 = vadd.f32 %v770_v32, %v1853_v40 }
 0x752   :  { %v782_v35 = vadd.f32 %v1516_v33, %v1847_v36  ;;  %v773_v38 = vpop.f32.mrb[39].mxu0 }
 0x753   :  { %v774_v42 = vadd.f32 %v773_v38, %v1851_v39 }
 0x754   :  { %v788_v43 = vpack.c.bf16 %v782_v35, %v779_v34  ;;  %1520 = vmatpush3.bf16.msra.mxu1 %v786_v29 }
 0x755   :  { %v787_v44 = vpack.c.bf16 %v774_v42, %v771_v41 }
 0x757   :  { %1521 = vmatprep.subr.bf16.mxu1 %v787_v44 }
 0x758   :  { %1522 = vmatpush3.bf16.msra.mxu1 %v787_v44 }
 0x759   :  { %1523 = vmatprep.subr.bf16.mxu1 %v788_v43 }
 0x75c   :  { %1524 = vmatpush3.bf16.msra.mxu1 %v788_v43 }
 0x75f   :  { %1526 = vmatmul.mubr.msk.bf16.vlgmr.msra.gmra.mrb[24].mxu1 %vm362_vm1, %v1815_v18 }
 0x760   :  { %1529 = vmatprep.mubr.msk.bf16.mxu1 %vm362_vm1, %v1820_v19 }
 0x767   :  { %1530 = vmatmul.mubr.msk.bf16.gmra.mrb[28].mxu1 %vm362_vm1, %v1829_v20 }
 0x768   :  { %1557 = vmatprep.mubr.msk.bf16.mxu1 %vm362_vm1, %v1803_v60 }
 0x832   :  { %v1527_v45 = vpop.f32.mrb[24].mxu1 }
 0x833   :  { %v823_v46 = vpop.f32.mrb[25].mxu1  ;;  %v832_v48 = vadd.f32 %v1527_v45, %v1837_v23 }
 0x834   :  { %v1528_v47 = vpop.f32.mrb[26].mxu1  ;;  %v824_v51 = vadd.f32 %v823_v46, %v1841_v26 }
 0x835   :  { %v835_v49 = vadd.f32 %v1528_v47, %v1835_v22  ;;  %v826_v50 = vpop.f32.mrb[27].mxu1 }
 0x836   :  { %v827_v52 = vadd.f32 %v826_v50, %v1839_v25 }
 0x837   :  { %v855_v53 = vpack.c.bf16 %v835_v49, %v832_v48 }
 0x838   :  { %v854_v54 = vpack.c.bf16 %v827_v52, %v824_v51  ;;  %v1061_v52 = vlaneseq }
 0x83a   :  { %v1531_v55 = vpop.f32.mrb[28].mxu1  ;;  %1533 = vmatprep.subr.bf16.mxu0 %v854_v54 }
 0x83b   :  { %v839_v56 = vpop.f32.mrb[29].mxu1  ;;  %1534 = vmatpush3.bf16.msra.mxu0 %v854_v54  ;;  %v848_v58 = vadd.f32 %v1531_v55, %v1849_v37 }
 0x83c   :  { %v1532_v57 = vpop.f32.mrb[30].mxu1  ;;  %1535 = vmatprep.subr.bf16.mxu0 %v855_v53  ;;  %v840_v62 = vadd.f32 %v839_v56, %v1853_v40 }
 0x83d   :  { %v851_v59 = vadd.f32 %v1532_v57, %v1847_v36  ;;  %v842_v61 = vpop.f32.mrb[31].mxu1 }
 0x83e   :  { %v843_v63 = vadd.f32 %v842_v61, %v1851_v39 }
 0x83f   :  { %v857_v0 = vpack.c.bf16 %v851_v59, %v848_v58  ;;  %1536 = vmatpush3.bf16.msra.mxu0 %v855_v53  ;;  %v1991_v53 = vand.u32 127, %v1061_v52 }
 0x840   :  { %v856_v1 = vpack.c.bf16 %v843_v63, %v840_v62 }
 0x841   :  { %vm1063_vm2 = vcmp.lt.s32.totalorder %v1991_v53, 8 }
 0x842   :  { %1537 = vmatprep.subr.bf16.mxu0 %v856_v1 }
 0x843   :  { %1538 = vmatpush3.bf16.msra.mxu0 %v856_v1 }
 0x844   :  { %1539 = vmatprep.subr.bf16.mxu0 %v857_v0 }
 0x847   :  { %1540 = vmatpush3.bf16.msra.mxu0 %v857_v0 }
 0x84a   :  { %1542 = vmatmul.mubr.msk.bf16.vlgmr.msra.gmra.mrb[40].mxu0 %vm362_vm1, %v1815_v18 }
 0x84b   :  { %1545 = vmatprep.mubr.msk.bf16.mxu0 %vm362_vm1, %v1820_v19 }
 0x852   :  { %1546 = vmatmul.mubr.msk.bf16.gmra.mrb[44].mxu0 %vm362_vm1, %v1829_v20 }
 0x853   :  { %1573 = vmatprep.mubr.msk.bf16.mxu0 %vm362_vm1, %v1803_v60 }
 0x91d   :  { %v1543_v2 = vpop.f32.mrb[40].mxu0 }
 0x91e   :  { %v892_v3 = vpop.f32.mrb[41].mxu0  ;;  %v901_v5 = vadd.f32 %v1543_v2, %v1837_v23 }
 0x91f   :  { %v1544_v4 = vpop.f32.mrb[42].mxu0  ;;  %v893_v8 = vadd.f32 %v892_v3, %v1841_v26 }
 0x920   :  { %v904_v6 = vadd.f32 %v1544_v4, %v1835_v22  ;;  %v895_v7 = vpop.f32.mrb[43].mxu0 }
 0x921   :  { %v896_v9 = vadd.f32 %v895_v7, %v1839_v25 }
 0x922   :  { %v924_v10 = vpack.c.bf16 %v904_v6, %v901_v5 }
 0x923   :  { %v923_v11 = vpack.c.bf16 %v896_v9, %v893_v8 }
 0x925   :  { %v1547_v12 = vpop.f32.mrb[44].mxu0  ;;  %1549 = vmatprep.subr.bf16.mxu1 %v923_v11 }
 0x926   :  { %v908_v13 = vpop.f32.mrb[45].mxu0  ;;  %1550 = vmatpush3.bf16.msra.mxu1 %v923_v11  ;;  %v917_v60 = vadd.f32 %v1547_v12, %v1849_v37 }
 0x927   :  { %v1548_v14 = vpop.f32.mrb[46].mxu0  ;;  %1551 = vmatprep.subr.bf16.mxu1 %v924_v10  ;;  %v909_v17 = vadd.f32 %v908_v13, %v1853_v40 }
 0x928   :  { %v920_v15 = vadd.f32 %v1548_v14, %v1847_v36  ;;  %v911_v16 = vpop.f32.mrb[47].mxu0 }
 0x929   :  { %v912_v21 = vadd.f32 %v911_v16, %v1851_v39 }
 0x92a   :  { %v926_v24 = vpack.c.bf16 %v920_v15, %v917_v60  ;;  %1552 = vmatpush3.bf16.msra.mxu1 %v924_v10 }
 0x92b   :  { %v925_v27 = vpack.c.bf16 %v912_v21, %v909_v17 }
 0x92d   :  { %1553 = vmatprep.subr.bf16.mxu1 %v925_v27 }
 0x92e   :  { %1554 = vmatpush3.bf16.msra.mxu1 %v925_v27 }
 0x92f   :  { %1555 = vmatprep.subr.bf16.mxu1 %v926_v24 }
 0x932   :  { %1556 = vmatpush3.bf16.msra.mxu1 %v926_v24 }
 0x935   :  { %1558 = vmatmul.mubr.msk.bf16.vlgmr.msra.gmra.mrb[32].mxu1 %vm362_vm1, %v1815_v18 }
 0x936   :  { %1561 = vmatprep.mubr.msk.bf16.mxu1 %vm362_vm1, %v1820_v19 }
 0x93d   :  { %1562 = vmatmul.mubr.msk.bf16.gmra.mrb[36].mxu1 %vm362_vm1, %v1829_v20 }
 0xa08   :  { %v1559_v28 = vpop.f32.mrb[32].mxu1 }
 0xa09   :  { %v961_v29 = vpop.f32.mrb[33].mxu1  ;;  %v970_v31 = vadd.f32 %v1559_v28, %v1837_v23 }
 0xa0a   :  { %v1560_v30 = vpop.f32.mrb[34].mxu1  ;;  %v962_v34 = vadd.f32 %v961_v29, %v1841_v26 }
 0xa0b   :  { %v973_v32 = vadd.f32 %v1560_v30, %v1835_v22  ;;  %v964_v33 = vpop.f32.mrb[35].mxu1 }
 0xa0c   :  { %v965_v35 = vadd.f32 %v964_v33, %v1839_v25 }
 0xa0d   :  { %v993_v38 = vpack.c.bf16 %v973_v32, %v970_v31 }
 0xa0e   :  { %v992_v41 = vpack.c.bf16 %v965_v35, %v962_v34 }
 0xa10   :  { %v1563_v42 = vpop.f32.mrb[36].mxu1  ;;  %1565 = vmatprep.subr.bf16.mxu0 %v992_v41 }
 0xa11   :  { %v977_v43 = vpop.f32.mrb[37].mxu1  ;;  %1566 = vmatpush3.bf16.msra.mxu0 %v992_v41  ;;  %v986_v45 = vadd.f32 %v1563_v42, %v1849_v37 }
 0xa12   :  { %v1564_v44 = vpop.f32.mrb[38].mxu1  ;;  %1567 = vmatprep.subr.bf16.mxu0 %v993_v38  ;;  %v978_v48 = vadd.f32 %v977_v43, %v1853_v40 }
 0xa13   :  { %v989_v46 = vadd.f32 %v1564_v44, %v1847_v36  ;;  %v980_v47 = vpop.f32.mrb[39].mxu1 }
 0xa14   :  { %v981_v49 = vadd.f32 %v980_v47, %v1851_v39 }
 0xa15   :  { %v995_v50 = vpack.c.bf16 %v989_v46, %v986_v45  ;;  %1568 = vmatpush3.bf16.msra.mxu0 %v993_v38 }
 0xa16   :  { %v994_v51 = vpack.c.bf16 %v981_v49, %v978_v48 }
 0xa18   :  { %1569 = vmatprep.subr.bf16.mxu0 %v994_v51 }
 0xa19   :  { %1570 = vmatpush3.bf16.msra.mxu0 %v994_v51 }
 0xa1a   :  { %1571 = vmatprep.subr.bf16.mxu0 %v995_v50 }
 0xa1d   :  { %1572 = vmatpush3.bf16.msra.mxu0 %v995_v50 }
 0xa20   :  { %1574 = vmatmul.mubr.msk.bf16.vlgmr.msra.gmra.mrb[48].mxu0 %vm362_vm1, %v1815_v18 }
 0xa21   :  { %1577 = vmatprep.mubr.msk.bf16.mxu0 %vm362_vm1, %v1820_v19 }
 0xa28   :  { %1578 = vmatmul.mubr.msk.bf16.gmra.mrb[52].mxu0 %vm362_vm1, %v1829_v20 }
 0xaf3   :  { %v1575_v54 = vpop.f32.mrb[48].mxu0 }
 0xaf4   :  { %v1039_v55 = vadd.f32 %v1575_v54, %v1837_v23  ;;  %v1030_v56 = vpop.f32.mrb[49].mxu0 }
 0xaf5   :  { %v1031_v57 = vadd.f32 %v1030_v56, %v1841_v26  ;;  %v1576_v58 = vpop.f32.mrb[50].mxu0 }
 0xaf6   :  { %v1042_v18 = vadd.f32 %v1576_v58, %v1835_v22  ;;  %v1033_v59 = vpop.f32.mrb[51].mxu0  ;;  %v1066_v19 = vsel %vm1063_vm2, %v1039_v55, -inf }
 0xaf7   :  { %v1034_v20 = vadd.f32 %v1033_v59, %v1839_v25  ;;  %1076 = vmax.xlane.f32.xlu1 %v1066_v19  ;;  %v1064_v61 = vsel %vm1063_vm2, %v1031_v57, -inf }
 0xaf8   :  { %1072 = vmax.xlane.f32.xlu0 %v1064_v61  ;;  %v1067_v23 = vsel %vm1063_vm2, %v1042_v18, -inf }
 0xaf9   :  { %v1065_v26 = vsel %vm1063_vm2, %v1034_v20, -inf }
 0xafb   :  { %1078 = vmax.xlane.f32.xlu1 %v1067_v23  ;;  %v1579_v62 = vpop.f32.mrb[52].mxu0 }
 0xafc   :  { %v1046_v22 = vpop.f32.mrb[53].mxu0  ;;  %1074 = vmax.xlane.f32.xlu0 %v1065_v26  ;;  %v1055_v25 = vadd.f32 %v1579_v62, %v1849_v37 }
 0xafd   :  { %v1047_v63 = vadd.f32 %v1046_v22, %v1853_v40  ;;  %v1580_v0 = vpop.f32.mrb[54].mxu0 }
 0xafe   :  { %v1049_v1 = vpop.f32.mrb[55].mxu0  ;;  %v1058_v4 = vadd.f32 %v1580_v0, %v1847_v36  ;;  %v1070_v6 = vsel %vm1063_vm2, %v1055_v25, -inf }
 0xaff   :  { %v1050_v2 = vadd.f32 %v1049_v1, %v1851_v39  ;;  %v1068_v3 = vsel %vm1063_vm2, %v1047_v63, -inf }
 0xb00   :  { %1080 = vmax.xlane.f32.xlu0 %v1068_v3  ;;  %v1071_v40 = vsel %vm1063_vm2, %v1058_v4, -inf }
 0xb01   :  { %v1069_v5 = vsel %vm1063_vm2, %v1050_v2, -inf }
 0xb02   :  { %1082 = vmax.xlane.f32.xlu1 %v1069_v5 }
 0xb04   :  { %1084 = vmax.xlane.f32.xlu0 %v1070_v6 }
 0xb06   :  { %1086 = vmax.xlane.f32.xlu1 %v1071_v40 }
 0xb84   :  { %v1077_v37 = vpop.xlane.xlu1 %1076 }
 0xb85   :  { %v2018_v39 = vsub.f32 %v1066_v19, %v1077_v37  ;;  %v1073_v7 = vpop.xlane.xlu0 %1072 }
 0xb86   :  { %v2020_v8 = vsub.f32 %v1064_v61, %v1073_v7 }
 0xb87   :  { %v1100_v36 = vmul.f32 1.442695, %v2018_v39 }
 0xb88   :  { %v1096_v9 = vmul.f32 1.442695, %v2020_v8  ;;  %v1079_v10 = vpop.xlane.xlu1 %1078 }
 0xb89   :  { %1625 = vpow2.f32 %v1100_v36  ;;  %v2024_v11 = vsub.f32 %v1067_v23, %v1079_v10  ;;  %v1075_v12 = vpop.xlane.xlu0 %1074 }
 0xb8a   :  { %v2026_v13 = vsub.f32 %v1065_v26, %v1075_v12  ;;  %1627 = vpow2.f32 %v1096_v9 }
 0xb8b   :  { %v1102_v14 = vmul.f32 1.442695, %v2024_v11 }
 0xb8c   :  { %v1098_v60 = vmul.f32 1.442695, %v2026_v13 }
 0xb8d   :  { %1629 = vpow2.f32 %v1102_v14  ;;  %v1081_v15 = vpop.xlane.xlu0 %1080 }
 0xb8e   :  { %v2030_v16 = vsub.f32 %v1068_v3, %v1081_v15  ;;  %1631 = vpow2.f32 %v1098_v60 }
 0xb8f   :  { %v1083_v17 = vpop.xlane.xlu1 %1082 }
 0xb90   :  { %v1104_v21 = vmul.f32 1.442695, %v2030_v16  ;;  %v2033_v24 = vsub.f32 %v1069_v5, %v1083_v17 }
 0xb91   :  { %v1085_v27 = vpop.xlane.xlu0 %1084 }
 0xb92   :  { %1633 = vpow2.f32 %v1104_v21  ;;  %v1106_v28 = vmul.f32 1.442695, %v2033_v24  ;;  %v2036_v29 = vsub.f32 %v1070_v6, %v1085_v27 }
 0xb93   :  { %v1626_v30 = vpop.eup %1625  ;;  %v1087_v31 = vpop.xlane.xlu1 %1086 }
 0xb94   :  { %1635 = vpow2.f32 %v1106_v28  ;;  %v1108_v32 = vmul.f32 1.442695, %v2036_v29  ;;  %v2039_v33 = vsub.f32 %v1071_v40, %v1087_v31  ;;  %v1114_v34 = vsel %vm1063_vm2, %v1626_v30, 0.0  ;;  %v1628_v35 = vpop.eup %1627 }
 0xb95   :  { %1124 = vadd.xlane.f32.xlu0 %v1114_v34  ;;  %v1112_v43 = vsel %vm1063_vm2, %v1628_v35, 0.0 }
 0xb96   :  { %1637 = vpow2.f32 %v1108_v32  ;;  %v1110_v38 = vmul.f32 1.442695, %v2039_v33 }
 0xb97   :  { %v1630_v41 = vpop.eup %1629 }
 0xb98   :  { %1639 = vpow2.f32 %v1110_v38  ;;  %v1115_v42 = vsel %vm1063_vm2, %v1630_v41, 0.0  ;;  %v1632_v44 = vpop.eup %1631 }
 0xb99   :  { %1126 = vadd.xlane.f32.xlu1 %v1115_v42  ;;  %1120 = vadd.xlane.f32.xlu0 %v1112_v43  ;;  %v1113_v46 = vsel %vm1063_vm2, %v1632_v44, 0.0 }
 0xb9c   :  { %v1634_v45 = vpop.eup %1633 }
 0xb9d   :  { %1122 = vadd.xlane.f32.xlu1 %v1113_v46  ;;  %v1116_v47 = vsel %vm1063_vm2, %v1634_v45, 0.0 }
 0xb9e   :  { %v1636_v48 = vpop.eup %1635  ;;  %1128 = vadd.xlane.f32.xlu0 %v1116_v47 }
 0xb9f   :  { %v1117_v49 = vsel %vm1063_vm2, %v1636_v48, 0.0 }
 0xba0   :  { %v1638_v50 = vpop.eup %1637 }
 0xba1   :  { %1130 = vadd.xlane.f32.xlu1 %v1117_v49  ;;  %v1118_v51 = vsel %vm1063_vm2, %v1638_v50, 0.0 }
 0xba2   :  { %v1640_v52 = vpop.eup %1639  ;;  %1132 = vadd.xlane.f32.xlu0 %v1118_v51 }
 0xba3   :  { %v1119_v54 = vsel %vm1063_vm2, %v1640_v52, 0.0 }
 0xba5   :  { %1134 = vadd.xlane.f32.xlu1 %v1119_v54 }
 0xc22   :  { %v1125_v55 = vpop.xlane.xlu0 %1124 }
 0xc23   :  { %1641 = vlog2.f32 %v1125_v55 }
 0xc26   :  { %v1127_v56 = vpop.xlane.xlu1 %1126  ;;  %v1121_v57 = vpop.xlane.xlu0 %1120 }
 0xc27   :  { %1643 = vlog2.f32 %v1127_v56 }
 0xc28   :  { %1645 = vlog2.f32 %v1121_v57 }
 0xc2a   :  { %v1123_v58 = vpop.xlane.xlu1 %1122 }
 0xc2b   :  { %1647 = vlog2.f32 %v1123_v58  ;;  %v1129_v18 = vpop.xlane.xlu0 %1128 }
 0xc2c   :  { %1649 = vlog2.f32 %v1129_v18 }
 0xc2d   :  { %v1642_v59 = vpop.eup %1641 }
 0xc2e   :  { %v1141_v19 = vmul.f32 0.6931472, %v1642_v59  ;;  %v1131_v20 = vpop.xlane.xlu1 %1130 }
 0xc2f   :  { %1651 = vlog2.f32 %v1131_v20  ;;  %v1133_v61 = vpop.xlane.xlu0 %1132 }
 0xc30   :  { %v1154_v23 = vsub.f32 %v2018_v39, %v1141_v19  ;;  %1653 = vlog2.f32 %v1133_v61 }
 0xc31   :  { %v1644_v62 = vpop.eup %1643 }
 0xc32   :  { %v1646_v26 = vpop.eup %1645  ;;  %v1162_v22 = vsel %vm1063_vm2, %v1154_v23, 0.0  ;;  %v1143_v63 = vmul.f32 0.6931472, %v1644_v62  ;;  %v1135_v0 = vpop.xlane.xlu1 %1134 }
 0xc33   :  { %1170 = vst [vmem:[#allocation5 + $0x10] sm:$0xff] %v1162_v22  ;;  %v1137_v1 = vmul.f32 0.6931472, %v1646_v26  ;;  %1655 = vlog2.f32 %v1135_v0 }
 0xc34   :  { %v1155_v25 = vsub.f32 %v2024_v11, %v1143_v63 }
 0xc35   :  { %v1648_v2 = vpop.eup %1647  ;;  %v1152_v3 = vsub.f32 %v2020_v8, %v1137_v1 }
 0xc36   :  { %v1650_v4 = vpop.eup %1649  ;;  %v1163_v5 = vsel %vm1063_vm2, %v1155_v25, 0.0  ;;  %v1139_v6 = vmul.f32 0.6931472, %v1648_v2 }
 0xc37   :  { %1171 = vst [vmem:[#allocation5 + $0x18] sm:$0xff] %v1163_v5  ;;  %v1160_v40 = vsel %vm1063_vm2, %v1152_v3, 0.0  ;;  %v1145_v37 = vmul.f32 0.6931472, %v1650_v4 }
 0xc38   :  { %1168 = vst [vmem:[#allocation5] sm:$0xff] %v1160_v40  ;;  %v1153_v39 = vsub.f32 %v2026_v13, %v1139_v6 }
 0xc39   :  { %v1652_v7 = vpop.eup %1651  ;;  %v1156_v36 = vsub.f32 %v2030_v16, %v1145_v37 }
 0xc3a   :  { %v1654_v9 = vpop.eup %1653  ;;  %v1161_v8 = vsel %vm1063_vm2, %v1153_v39, 0.0  ;;  %v1147_v10 = vmul.f32 0.6931472, %v1652_v7 }
 0xc3b   :  { %1169 = vst [vmem:[#allocation5 + $0x8] sm:$0xff] %v1161_v8  ;;  %v1164_v11 = vsel %vm1063_vm2, %v1156_v36, 0.0  ;;  %v1149_v12 = vmul.f32 0.6931472, %v1654_v9 }
 0xc3c   :  { %1172 = vst [vmem:[#allocation5 + $0x20] sm:$0xff] %v1164_v11  ;;  %v1157_v14 = vsub.f32 %v2033_v24, %v1147_v10 }
 0xc3d   :  { %v1656_v60 = vpop.eup %1655  ;;  %v1158_v15 = vsub.f32 %v2036_v29, %v1149_v12 }
 0xc3e   :  { %v1165_v13 = vsel %vm1063_vm2, %v1157_v14, 0.0  ;;  %v1151_v16 = vmul.f32 0.6931472, %v1656_v60 }
 0xc3f   :  { %1173 = vst [vmem:[#allocation5 + $0x28] sm:$0xff] %v1165_v13  ;;  %v1166_v17 = vsel %vm1063_vm2, %v1158_v15, 0.0 }
 0xc40   :  { %1174 = vst [vmem:[#allocation5 + $0x30] sm:$0xff] %v1166_v17  ;;  %v1159_v21 = vsub.f32 %v2039_v33, %v1151_v16 }
 0xc42   :  { %v1167_v24 = vsel %vm1063_vm2, %v1159_v21, 0.0 }
 0xc43   :  { %1175 = vst [vmem:[#allocation5 + $0x38] sm:$0xff] %v1167_v24 }
 0xc44   :  { %1690 = shalt.err (!%p1687_p12)
}
 0xc45   :  { %s1691_s1 = scalar_lea.hbm %s2103_s6, 1024 }
 0xc46   :  { %p1692_p13 = scmp.ne.s32.totalorder %s2103_s6, %s1691_s1  ;;  %p1695_p0 = scmp.lt.u32.totalorder %s1691_s1, %s2103_s6 }
 0xc48   :  { %p1697_p1 = pnand %p1695_p0, %p1692_p13 }
 0xc4a   :  { %1700 = shalt.err (!%p1697_p1)
}
 0xc4b   :  { %1187 = dma.vmem_to_hbm [thread:$0]  %s1182_s16, 1024, %s2103_s6, [#allocation4], %s1706_s7, %s1706_s7, %s1707_s8  }
 0xc4c   :  { %1703 = dma.done.wait [#allocation4], 1024  }
 0xc4d   :  { %1704 = vsyncadd [#allocation4], 4294966272 }
 0xc4e   :  { %1191 = vsyncpa [#allocation3], 1 }
 0xc4f   :  { %1192 = vsyncpa [#allocation4], 1 }

</bundles_post_ra>
